<compile_context>
chip_gen: v6e
topology: v6e:2x2x1
jax: 0.10.0
libtpu: 0.0.40
codegen_flags: <defaults>
</compile_context>

<pallas_src>
import jax
import jax.numpy as jnp
from jax.experimental import pallas as pl
from jax.experimental.pallas import tpu as pltpu

_LANE = 128
_UNROLL_C_MAX = 64


def _round_up(v, m):
    return (v + m - 1) // m * m


def _attention_block_kernel(x_ref, w_ref, b_ref, o_ref):
    # x_ref: (bn, C, ts) VMEM   w_ref: (C,) SMEM f32   b_ref: (1,) SMEM f32
    # o_ref: (bn, C, ts) VMEM
    bn, C, ts = x_ref.shape

    logits = jnp.full((bn, 1, ts), b_ref[0], jnp.float32)
    if C <= _UNROLL_C_MAX:
        # Unrolled per-channel scalar-x-vector FMA (VPU); each term is only
        # (bn, 1, ts) f32 — no whole-block f32 temporary for the conv.
        for c in range(C):
            logits = logits + x_ref[:, c:c + 1, :].astype(jnp.float32) * w_ref[c]
    else:
        def body(c, acc):
            return acc + x_ref[:, pl.ds(c, 1), :].astype(jnp.float32) * w_ref[c]
        logits = jax.lax.fori_loop(0, C, body, logits)

    attn = jax.nn.sigmoid(logits)                         # (bn, 1, ts) f32 (EUP)

    # Multiply in f32 and cast the product once (matches the f32 reference,
    # including for bf16 inputs).
    o_ref[...] = (x_ref[...].astype(jnp.float32) * attn).astype(o_ref.dtype)


def _default_budgets():
    """(block_budget_bytes, vmem_limit_bytes) sized per TPU generation."""
    vmem_cap = 64 * 1024 * 1024
    try:
        info = pltpu.get_tpu_info()
        vmem_cap = int(getattr(info, "vmem_capacity_bytes", vmem_cap)) or vmem_cap
    except Exception:
        pass
    if vmem_cap >= 128 * 1024 * 1024:
        # v5e / v6e: 128 MiB physical VMEM — large blocks, 64 MiB scoped limit.
        return 10 * 1024 * 1024, 64 * 1024 * 1024
    # v7x (64 MiB per TensorCore) or unknown: stay conservative so
    # 2(in)+2(out) double-buffers + elementwise temporaries fit with headroom.
    return 6 * 1024 * 1024, 44 * 1024 * 1024


def attention_block(x, weight, bias, *, block_budget_bytes=None,
                    vmem_limit_bytes=None):
    """x: (N, C, H, W); weight: (1, C, 1, 1); bias: (1,) -> x * sigmoid(conv1x1(x))."""
    N, C, H, W = x.shape
    S = H * W
    itemsize = jnp.dtype(x.dtype).itemsize

    default_bb, default_vl = _default_budgets()
    if block_budget_bytes is None:
        block_budget_bytes = default_bb
    if vmem_limit_bytes is None:
        vmem_limit_bytes = default_vl

    # Dtype-aware sublane packing: 32-bit -> 8, 16-bit -> 16, 8-bit -> 32.
    sublane_pack = max(8, 32 // max(itemsize, 1))
    c_sublanes = _round_up(max(C, 1), sublane_pack)
    # TODO(synk): for very large C (c_sublanes * 128 * itemsize > budget) add a
    # channel-tiling grid axis with a logits accumulator (pl.when init/finalize).

    # ---- spatial tile (lane axis): multiple of 128, grown to fill the block
    # budget so per-grid-step overhead is amortized; last block is masked. ----
    s_pad128 = _round_up(S, _LANE)
    row_bytes = c_sublanes * itemsize                     # bytes per lane per batch elem
    budget_lanes = max(
        _LANE, (block_budget_bytes // max(row_bytes, 1)) // _LANE * _LANE)
    ts = min(s_pad128, budget_lanes)
    n_s_blocks = pl.cdiv(S, ts)

    # ---- batch packing: cdiv-based (works for any N, including primes);
    # overhanging batch rows are masked on store. ----
    per_batch_bytes = c_sublanes * ts * itemsize
    bn = max(1, min(N, block_budget_bytes // max(per_batch_bytes, 1)))
    n_n_blocks = pl.cdiv(N, bn)

    # ---- v7x has 2 TensorCores per chip: keep >= 2 blocks on a parallel axis
    # when the grid would otherwise collapse to (1, 1). ----
    if n_n_blocks * n_s_blocks == 1:
        if s_pad128 >= 2 * _LANE:
            ts = _round_up(pl.cdiv(s_pad128, 2), _LANE)
            n_s_blocks = pl.cdiv(S, ts)
        elif N >= 2:
            bn = pl.cdiv(N, 2)
            n_n_blocks = pl.cdiv(N, bn)

    grid = (n_n_blocks, n_s_blocks)

    # ---- layout: NCHW -> (N, C, S) is a free contiguous reshape; no pad. ----
    x_flat = x.reshape(N, C, S)
    w_smem = weight.reshape(C).astype(jnp.float32)
    b_smem = bias.reshape(1).astype(jnp.float32)

    out_flat = pl.pallas_call(
        _attention_block_kernel,
        out_shape=jax.ShapeDtypeStruct((N, C, S), x.dtype),
        grid_spec=pltpu.PrefetchScalarGridSpec(
            num_scalar_prefetch=0,
            grid=grid,
            in_specs=[
                pl.BlockSpec((bn, C, ts), lambda n, s: (n, 0, s)),
                pl.BlockSpec(memory_space=pltpu.MemorySpace.SMEM),
                pl.BlockSpec(memory_space=pltpu.MemorySpace.SMEM),
            ],
            out_specs=pl.BlockSpec((bn, C, ts), lambda n, s: (n, 0, s)),
        ),
        compiler_params=pltpu.CompilerParams(
            dimension_semantics=("parallel", "parallel"),
            vmem_limit_bytes=int(vmem_limit_bytes),
        ),
    )(x_flat, w_smem, b_smem)

    return out_flat.reshape(N, C, H, W)


def _reference(x, weight, bias):
    xf = x.astype(jnp.float32)
    w = weight.reshape(-1).astype(jnp.float32)
    b = bias.reshape(()).astype(jnp.float32)
    logits = jnp.einsum("nchw,c->nhw", xf, w)[:, None, :, :] + b
    return xf * jax.nn.sigmoid(logits)


if __name__ == "__main__":
    key = jax.random.PRNGKey(0)
    kx, kw, kb = jax.random.split(key, 3)

    def run_case(N, C, H, W, dtype, atol, rtol):
        # Conv2d(channels, 1, kernel_size=1): weight (1, C, 1, 1), bias (1,)
        x = jax.random.normal(kx, (N, C, H, W), dtype=jnp.float32).astype(dtype)
        weight = jax.random.normal(kw, (1, C, 1, 1), dtype=jnp.float32) * 0.1
        bias = jax.random.normal(kb, (1,), dtype=jnp.float32) * 0.1

        out = jax.block_until_ready(attention_block(x, weight, bias))
        ref = _reference(x, weight, bias)
        assert out.shape == (N, C, H, W)
        assert out.dtype == x.dtype
        assert jnp.allclose(out.astype(jnp.float32), ref, atol=atol, rtol=rtol), (
            f"mismatch vs reference for {(N, C, H, W, str(dtype))}")

    # Lane-dense, multi-spatial-block path.
    run_case(2, 4, 16, 16, jnp.float32, 1e-5, 1e-5)
    # Non-128-multiple S and non-divisor batch: masked lanes + batch overhang.
    run_case(3, 5, 10, 10, jnp.float32, 1e-5, 1e-5)
    # bf16 input path (dtype-aware sublane budgeting, f32 compute).
    run_case(2, 4, 16, 16, jnp.bfloat16, 3e-2, 3e-2)

    print("KERNEL_OK")
</pallas_src>

<mosaic_0001>
module attributes {stable_mosaic.version = 11 : i64} {
  func.func @_attention_block_kernel(%arg0: i32, %arg1: i32, %arg2: memref<2x4x128xf32, #tpu.memory_space<vmem>>, %arg3: memref<4xf32, #tpu.memory_space<smem>>, %arg4: memref<1xf32, #tpu.memory_space<smem>>, %arg5: memref<2x4x128xf32, #tpu.memory_space<vmem>>) attributes {dimension_semantics = [#tpu.dimension_semantics<parallel>, #tpu.dimension_semantics<parallel>], iteration_bounds = array<i64: 1, 2>, scalar_prefetch = 0 : i64, scratch_operands = 0 : i64, tpu.core_type = #tpu.core_type<tc>, window_params = [{transform_indices = @transform_0, window_bounds = array<i64: 2, 4, 128>}, {transform_indices = @transform_1, window_bounds = array<i64: 4>}, {transform_indices = @transform_2, window_bounds = array<i64: 1>}, {transform_indices = @transform_3, window_bounds = array<i64: 2, 4, 128>}]} {
    %c0 = arith.constant 0 : index
    %0 = memref.load %arg4[%c0] : memref<1xf32, #tpu.memory_space<smem>>
    %1 = vector.broadcast %0 : f32 to vector<2x1x128xf32>
    %c0_0 = arith.constant 0 : index
    %c0_1 = arith.constant 0 : index
    %c0_2 = arith.constant 0 : index
    %2 = vector.load %arg2[%c0_0, %c0_1, %c0_2] : memref<2x4x128xf32, #tpu.memory_space<vmem>>, vector<2x1x128xf32>
    %c0_3 = arith.constant 0 : index
    %3 = memref.load %arg3[%c0_3] : memref<4xf32, #tpu.memory_space<smem>>
    %4 = vector.broadcast %3 : f32 to vector<2x1x128xf32>
    %5 = arith.mulf %2, %4 : vector<2x1x128xf32>
    %6 = arith.addf %1, %5 : vector<2x1x128xf32>
    %c0_4 = arith.constant 0 : index
    %c1 = arith.constant 1 : index
    %c0_5 = arith.constant 0 : index
    %7 = vector.load %arg2[%c0_4, %c1, %c0_5] : memref<2x4x128xf32, #tpu.memory_space<vmem>>, vector<2x1x128xf32>
    %c1_6 = arith.constant 1 : index
    %8 = memref.load %arg3[%c1_6] : memref<4xf32, #tpu.memory_space<smem>>
    %9 = vector.broadcast %8 : f32 to vector<2x1x128xf32>
    %10 = arith.mulf %7, %9 : vector<2x1x128xf32>
    %11 = arith.addf %6, %10 : vector<2x1x128xf32>
    %c0_7 = arith.constant 0 : index
    %c2 = arith.constant 2 : index
    %c0_8 = arith.constant 0 : index
    %12 = vector.load %arg2[%c0_7, %c2, %c0_8] : memref<2x4x128xf32, #tpu.memory_space<vmem>>, vector<2x1x128xf32>
    %c2_9 = arith.constant 2 : index
    %13 = memref.load %arg3[%c2_9] : memref<4xf32, #tpu.memory_space<smem>>
    %14 = vector.broadcast %13 : f32 to vector<2x1x128xf32>
    %15 = arith.mulf %12, %14 : vector<2x1x128xf32>
    %16 = arith.addf %11, %15 : vector<2x1x128xf32>
    %c0_10 = arith.constant 0 : index
    %c3 = arith.constant 3 : index
    %c0_11 = arith.constant 0 : index
    %17 = vector.load %arg2[%c0_10, %c3, %c0_11] : memref<2x4x128xf32, #tpu.memory_space<vmem>>, vector<2x1x128xf32>
    %c3_12 = arith.constant 3 : index
    %18 = memref.load %arg3[%c3_12] : memref<4xf32, #tpu.memory_space<smem>>
    %19 = vector.broadcast %18 : f32 to vector<2x1x128xf32>
    %20 = arith.mulf %17, %19 : vector<2x1x128xf32>
    %21 = arith.addf %16, %20 : vector<2x1x128xf32>
    %22 = arith.negf %21 : vector<2x1x128xf32>
    %23 = math.exp %22 : vector<2x1x128xf32>
    %cst = arith.constant 1.000000e+00 : f32
    %24 = vector.broadcast %cst : f32 to vector<2x1x128xf32>
    %25 = arith.addf %24, %23 : vector<2x1x128xf32>
    %26 = arith.divf %24, %25 : vector<2x1x128xf32>
    %c0_13 = arith.constant 0 : index
    %c0_14 = arith.constant 0 : index
    %c0_15 = arith.constant 0 : index
    %27 = vector.load %arg2[%c0_13, %c0_14, %c0_15] : memref<2x4x128xf32, #tpu.memory_space<vmem>>, vector<2x4x128xf32>
    %28 = vector.broadcast %26 : vector<2x1x128xf32> to vector<2x4x128xf32>
    %29 = arith.mulf %27, %28 : vector<2x4x128xf32>
    %c0_16 = arith.constant 0 : index
    %c0_17 = arith.constant 0 : index
    %c0_18 = arith.constant 0 : index
    %30 = vector.load %arg5[%c0_16, %c0_17, %c0_18] : memref<2x4x128xf32, #tpu.memory_space<vmem>>, vector<2x4x128xf32>
    tpu.vector_store %arg5[%c0_16, %c0_17, %c0_18], %29 {strides = array<i32>} : memref<2x4x128xf32, #tpu.memory_space<vmem>>, vector<2x4x128xf32>,
    return
  }
  func.func @transform_0(%arg0: i32, %arg1: i32) -> (i32, i32, i32) {
    %c0_i32 = arith.constant 0 : i32
    %c0_i32_0 = arith.constant 0 : i32
    return %arg0, %c0_i32, %arg1 : i32, i32, i32
  }
  func.func @transform_1(%arg0: i32, %arg1: i32) -> i32 {
    %c0_i32 = arith.constant 0 : i32
    %c0_i32_0 = arith.constant 0 : i32
    return %c0_i32 : i32
  }
  func.func @transform_2(%arg0: i32, %arg1: i32) -> i32 {
    %c0_i32 = arith.constant 0 : i32
    %c0_i32_0 = arith.constant 0 : i32
    return %c0_i32 : i32
  }
  func.func @transform_3(%arg0: i32, %arg1: i32) -> (i32, i32, i32) {
    %c0_i32 = arith.constant 0 : i32
    %c0_i32_0 = arith.constant 0 : i32
    return %arg0, %c0_i32, %arg1 : i32, i32, i32
  }
}

</mosaic_0001>

<bundles_post_ra>
// kernel: tpu_custom_call.1
= control target key start
LH: loop header
LB: loop body
LE: loop exit
PB: predicated region body
PF: predicated region fallthrough
CT: control target
= control target key end

     0   :  { %s864_s0 = inlined_call_operand.hbm [shape: f32[2,4,256], index: 0, kind: input, shape index: {}]   ;;  %s865_s1 = inlined_call_operand.vmem [shape: f32[4], index: 1, kind: input, shape index: {}]   ;;  %s866_s2 = inlined_call_operand.<no memory space> [shape: f32[1], index: 2, kind: input, shape index: {}]   ;;  %s867_s3 = inlined_call_operand.hbm [shape: f32[2,4,256], index: 3, kind: output, shape index: {}]  }
   0x1   :  { %8 = sst [smem:[#allocation2]] %s866_s2 }
   0x2   :  { %9 = vsyncpa [#allocation4], 0 }
   0x3   :  { %11 = vsyncpa [#allocation4 + $0x1], 0 }
   0x4   :  { %12 = vsyncpa [#allocation6], 0 }
   0x5   :  { %13 = vsyncpa [#allocation5], 0 }
   0x6   :  { %15 = vsyncpa [#allocation5 + $0x1], 0  ;;  %s665_s14 = smov 0   ;;  %s667_s15 = smov 0  }
   0x7   :  { %s669_s16 = smov 0   ;;  %s671_s17 = smov 0  }
   0x8   :  { %s673_s18 = smov 0   ;;  %s675_s19 = smov 0  }
   0x9 LB: > { %s397_s2 = sadd.s32 4294967295, %s631_s19   ;;  %s398_s20 = sadd.s32 4294967294, %s631_s19   ;;  %s631_s19 = sphi %s675_s19, %s21_s19   ;;  %s627_s18 = sphi %s673_s18, %s885_s18   ;;  %s623_s17 = sphi %s671_s17, %s884_s17   ;;  %s619_s16 = sphi %s669_s16, %s883_s16   ;;  %s615_s15 = sphi %s667_s15, %s882_s15   ;;  %s611_s14 = sphi %s665_s14, %s881_s14  }
   0xa   : > { %s42_s21 = sadd.s32 1, %s619_s16  ;;  %p49_p0 = scmp.ne.s32.totalorder %s619_s16, %s615_s15 }
   0xb   : > { %p50_p1 = scmp.eq.s32.totalorder %s631_s19, 0  ;;  %p55_p2 = scmp.ne.s32.totalorder %s615_s15, %s611_s14 }
   0xc   : > { %p703_p3 = scmp.eq.s32.totalorder %s397_s2, 0  ;;  %p123_p4 = scmp.eq.s32.totalorder %s397_s2, 1 }
   0xd   : > { %p707_p5 = por %p50_p1, %p49_p0  ;;  %p129_p6 = scmp.eq.s32.totalorder %s398_s20, 1 }
   0xe   : > { %p713_p7 = por %p703_p3, %p55_p2  ;;  %p717_p8 = por %p123_p4, %p49_p0 }
   0xf   : > { %p721_p9 = por %p129_p6, %p55_p2  ;;  %p399_p10 = scmp.ge.s32.totalorder %s631_s19, 1 }
  0x10   : > { %s872_s25 = scalar_select %p717_p8, 1, 0 }
  0x11   : > { %s873_s26 = scalar_select %p721_p9, 1, 0 }
  0x12   : > { %p136_p11 = scmp.lt.s32.totalorder %s631_s19, 3  ;;  %s149_s29 = sshll.u32 %s865_s1, 4  ;;  %s150_s29 = int_to_ptr.vmem [resolvable:$true] %s149_s29 }
  0x13   : > { %p438_p0 = scmp.lt.s32.totalorder %s631_s19, 2  ;;  %s30_s6 = sadd.s32 1, %s627_s18 }
  0x14   : > { %p730_p12 = pnand %p399_p10, %p136_p11  ;;  %p751_p6 = scmp.ge.s32.totalorder %s30_s6, 2 }
  0x15   : > { %p740_p2 = pnand %p438_p0, %p707_p5  ;;  %s163_s8 = sand.u32 1, %s619_s16  }
  0x16   : > { %p425_p1 = pneg %p730_p12  ;;  %s504_s9 = scalar_lea.vmem %s150_s29, 16 }
  0x17   : > { %p505_p10 = scmp.ne.s32.totalorder %s150_s29, %s504_s9  ;;  %p512_p13 = scmp.lt.s32.totalorder %s150_s29, %s150_s29 }
  0x18   : > { %p746_p4 = pnand %p425_p1, %p703_p3  ;;  %p513_p9 = scmp.lt.s32.totalorder %s504_s9, %s504_s9 }
  0x1a   : > { %p506_p11 = pneg %p746_p4  ;;  %p514_p8 = por %p513_p9, %p512_p13 }
  0x1c   : > { %p507_p5 = pnand %p506_p11, %p505_p10 }
  0x1e   : > { %p508_p0 = pneg %p507_p5 }
  0x20   : > { %p515_p1 = pnand %p514_p8, %p508_p0 }
  0x22   : > { %518 = shalt.err (!%p515_p1)
}
  0x23   : > { %s633_s10 = smov [#allocation7]   ;;  %s887_s6 = smov (%p751_p6, %s30_s6), 0 }
  0x24   : > { %428 = dma.vmem_to_smem (!%p746_p4), %s150_s29, 16, %s633_s10, [#allocation6]  }
  0x25   : > { %s402_s11 = sshll.u32 %s163_s8, 3  ;;  %s38_s12 = ssub.s32 %s627_s18, %s887_s6 }
  0x26   : > { %p40_p10 = scmp.eq.s32.totalorder %s38_s12, 0  ;;  %s403_s13 = sshll.u32 %s627_s18, 6 }
  0x27   : > { %s175_s23 = scalar_lea.hbm %s864_s0, %s403_s13  ;;  %s167_s27 = scalar_lea.vmem [#allocation3], %s402_s11 }
  0x28   : > { %s176_s28 = sshll.u32 %s167_s27, 4  ;;  %s164_s9 = scalar_lea.sflag [#allocation4], %s163_s8  ;;  %s177_s28 = int_to_ptr.vmem [resolvable:$true] %s176_s28 }
  0x29   : > { %s773_s5 = scalar_select %p40_p10, %s619_s16, %s42_s21  }
  0x2a   : > { %p521_p8 = pneg %p740_p2  ;;  %s532_s29 = scalar_lea.vmem %s177_s28, 128 }
  0x2b   : > { %p533_p9 = scmp.ne.s32.totalorder %s177_s28, %s532_s29  ;;  %s634_s7 = smov [#allocation3]  }
  0x2c   : > { %s537_s10 = sshll.u32 %s634_s7, 4  ;;  %s538_s10 = int_to_ptr.vmem [resolvable:$false] %s537_s10 }
  0x2d   : > { %p535_p13 = pnand %p533_p9, %p521_p8  ;;  %s539_s12 = scalar_lea.vmem %s538_s10, 256 }
  0x2e   : > { %p540_p6 = scmp.lt.s32.totalorder %s177_s28, %s538_s10  ;;  %p541_p11 = scmp.lt.s32.totalorder %s539_s12, %s532_s29 }
  0x2f   : > { %p536_p4 = pneg %p535_p13 }
  0x30   : > { %p542_p5 = por %p541_p11, %p540_p6 }
  0x32   : > { %p543_p0 = pnand %p542_p5, %p536_p4 }
  0x34   : > { %546 = shalt.err (!%p543_p0)
}
  0x35   : > { %s635_s11 = smov 128   ;;  %s636_s21 = smov 64  }
  0x36   : > { %s637_s13 = smov 4   ;;  %188 = sbr.rel (%p730_p12) target bundleno = 134 (0x86), region = 32 }
  0x37   : > { %432 = dma.hbm_to_vmem [thread:$0]  (!%p740_p2), %s175_s23, 128, %s177_s28, %s164_s9, %s635_s11, %s636_s21, %s637_s13  }
  0x38   : > { %s782_s8 = sand.u32 (!%p730_p12), 1, %s615_s15  }
  0x39   : > { %s405_s2 = sshll.u32 (!%p730_p12), %s782_s8, 3  ;;  %s191_s20 = scalar_lea.sflag (!%p730_p12), [#allocation4], %s782_s8 }
  0x3a   : > { %s788_s27 = scalar_lea.vmem (!%p730_p12), [#allocation3], %s405_s2 }
  0x3b   : > { %598 = dma.done.wait (%p713_p7), %s191_s20, 128  }
  0x3c   : > { %600 = vsyncadd (%p713_p7), %s191_s20, 4294967168 }
  0x3d   : > { %602 = dma.done.wait (%p703_p3), [#allocation6], 16  }
  0x3e   : > { %604 = vsyncadd (%p703_p3), [#allocation6], 4294967280 }
  0x3f   : > { %203 = sfence }
  0x40   : > { %s224_s30 = sld [smem:[#allocation2]]  ;;  %v226_v0 = vld [vmem:[%s788_s27] sm:$0x1]  ;;  %v227_v1 = vld [vmem:[%s788_s27 + $0x4] sm:$0x1]  ;;  %v272_v35 = vlaneseq  ;;  %s221_s22 = scalar_lea.vmem [#allocation8], %s405_s2 }
  0x41   : > { %s228_s4 = sld [smem:[#allocation7]]  ;;  %v234_v2 = vld [vmem:[%s788_s27 + $0x1] sm:$0x1]  ;;  %v235_v3 = vld [vmem:[%s788_s27 + $0x5] sm:$0x1]  ;;  %s300_s9 = sshll.u32 %s221_s22, 4  ;;  %s811_s9 = int_to_ptr.vmem [resolvable:$true] %s300_s9 }
  0x42   : > { %s408_s23 = sld [smem:[#allocation7 + $0x1]]  ;;  %v242_v6 = vld [vmem:[%s788_s27 + $0x2] sm:$0x1]  ;;  %v243_v10 = vld [vmem:[%s788_s27 + $0x6] sm:$0x1]  ;;  %v273_v36 = vshrl.u32 %v272_v35, 7 }
  0x43   : > { %s409_s28 = sld [smem:[#allocation7 + $0x2]]  ;;  %v250_v13 = vld [vmem:[%s788_s27 + $0x3] sm:$0x1]  ;;  %v251_v15 = vld [vmem:[%s788_s27 + $0x7] sm:$0x1]  ;;  %s414_s29 = sshll.u32 %s623_s17, 6 }
  0x44   : > { %s410_s24 = sld [smem:[#allocation7 + $0x3]]  ;;  %v274_v37 = vsub.s32 0, %v273_v36  ;;  %v270_v39 = vld [vmem:[%s788_s27] sm:$0xf]  ;;  %v271_v42 = vld [vmem:[%s788_s27 + $0x4] sm:$0xf]  ;;  %s816_s12 = scalar_lea.hbm %s867_s3, %s414_s29 }
  0x45   : > { %s285_s11 = scalar_lea.sflag [#allocation5], %s782_s8  ;;  %s547_s17 = scalar_lea.vmem %s811_s9, 128 }
  0x46   : > { %v225_v4 = vstv %s224_s30  ;;  %p548_p3 = scmp.ne.s32.totalorder %s811_s9, %s547_s17  ;;  %p878_p7 = scmp.ne.s32.totalorder %s872_s25, 0 }
  0x47   : > { %v229_v5 = vstv %s228_s4  ;;  %s638_s21 = smov [#allocation8]  }
  0x48   : > { %v230_v7 = vmul.f32 %v229_v5, %v226_v0  ;;  %v237_v8 = vstv %s408_s23  ;;  %v231_v9 = vmul.f32 %v229_v5, %v227_v1  ;;  %p549_p12 = pnand %p548_p3, %p878_p7  ;;  %s551_s13 = sshll.u32 %s638_s21, 4  ;;  %s552_s13 = int_to_ptr.vmem [resolvable:$false] %s551_s13 }
  0x49   : > { %v238_v11 = vmul.f32 %v237_v8, %v234_v2  ;;  %v245_v12 = vstv %s409_s28  ;;  %v239_v14 = vmul.f32 %v237_v8, %v235_v3  ;;  %s553_s2 = scalar_lea.vmem %s552_s13, 256  ;;  %p554_p1 = scmp.lt.s32.totalorder %s811_s9, %s552_s13 }
  0x4a   : > { %v232_v16 = vadd.f32 %v230_v7, %v225_v4  ;;  %v246_v17 = vmul.f32 %v245_v12, %v242_v6  ;;  %v253_v18 = vstv %s410_s24  ;;  %v233_v19 = vadd.f32 %v231_v9, %v225_v4  ;;  %p550_p2 = pneg %p549_p12  ;;  %p555_p10 = scmp.lt.s32.totalorder %s553_s2, %s547_s17 }
  0x4b   : > { %v247_v20 = vmul.f32 %v245_v12, %v243_v10  ;;  %v254_v22 = vmul.f32 %v253_v18, %v250_v13  ;;  %v255_v24 = vmul.f32 %v253_v18, %v251_v15 }
  0x4c   : > { %v240_v21 = vadd.f32 %v238_v11, %v232_v16  ;;  %v241_v23 = vadd.f32 %v239_v14, %v233_v19  ;;  %p556_p8 = por %p555_p10, %p554_p1 }
  0x4e   : > { %v248_v25 = vadd.f32 %v246_v17, %v240_v21  ;;  %v249_v26 = vadd.f32 %v247_v20, %v241_v23  ;;  %p557_p9 = pnand %p556_p8, %p550_p2 }
  0x50   : > { %v256_v27 = vadd.f32 %v254_v22, %v248_v25  ;;  %v257_v28 = vadd.f32 %v255_v24, %v249_v26 }
  0x52   : > { %v411_v29 = vmul.f32 -1.442695, %v256_v27  ;;  %v412_v30 = vmul.f32 -1.442695, %v257_v28 }
  0x54   : > { %496 = vpow2.f32 %v411_v29 }
  0x55   : > { %498 = vpow2.f32 %v412_v30 }
  0x61   : > { %v497_v31 = vpop.eup %496 }
  0x62   : > { %v499_v32 = vpop.eup %498  ;;  %v264_v33 = vadd.f32 1.0, %v497_v31 }
  0x63   : > { %v265_v34 = vadd.f32 1.0, %v499_v32 }
  0x64   : > { %500 = vrcp.f32 %v264_v33 }
  0x65   : > { %502 = vrcp.f32 %v265_v34 }
  0x71   : > { %v501_v38 = vpop.eup %500 }
  0x72   : > { %v503_v40 = vpop.eup %502  ;;  %v275_v41 = vrot.slane %v501_v38, %v274_v37 }
  0x73   : > { %v279_v43 = vrot.slane %v503_v40, %v274_v37 }
  0x74   : > { %v280_v44 = vmul.f32 %v275_v41, %v270_v39 }
  0x75   : > { %v281_v45 = vmul.f32 %v279_v43, %v271_v42 }
  0x76   : > { %282 = vst [vmem:[%s221_s22] sm:$0xf] %v280_v44 }
  0x77   : > { %283 = vst [vmem:[%s221_s22 + $0x4] sm:$0xf] %v281_v45 }
  0x78   : > { %560 = shalt.err (!%p557_p9)
}
  0x79   : > { %s561_s20 = scalar_lea.hbm %s816_s12, 128  ;;  %s565_s4 = scalar_lea.hbm %s867_s3, 256 }
  0x7a   : > { %p562_p13 = scmp.ne.s32.totalorder %s816_s12, %s561_s20  ;;  %p566_p11 = scmp.lt.s32.totalorder %s816_s12, %s867_s3 }
  0x7b   : > { %p567_p5 = scmp.lt.s32.totalorder %s565_s4, %s561_s20 }
  0x7c   : > { %p563_p4 = pnand %p562_p13, %p878_p7 }
  0x7d   : > { %p568_p0 = por %p567_p5, %p566_p11 }
  0x7e   : > { %p564_p6 = pneg %p563_p4 }
  0x80   : > { %p569_p3 = pnand %p568_p0, %p564_p6 }
  0x82   : > { %572 = shalt.err (!%p569_p3)
}
  0x83   : > { %s639_s24 = smov 64   ;;  %s640_s22 = smov 128  }
  0x84   : > { %s641_s29 = smov 4  }
  0x85   : > { %423 = dma.vmem_to_hbm [thread:$0]  (%p878_p7), %s811_s9, 128, %s816_s12, %s285_s11, %s639_s24, %s640_s22, %s641_s29  }
  0x86 PF: > { %s315_s7 = sand.u32 1, %s611_s14   ;;  %p879_p12 = scmp.ne.s32.totalorder %s873_s26, 0 }
  0x87   : > { %p880_p2 = scmp.ge.s32.totalorder %s631_s19, 2  ;;  %s316_s10 = scalar_lea.sflag [#allocation5], %s315_s7 }
  0x89   : > { %p434_p1 = pnand %p880_p2, %p879_p12 }
  0x8b   : > { %p435_p10 = pneg %p434_p1 }
  0x8d   : > { %606 = dma.done.wait (%p435_p10), %s316_s10, 128  }
  0x8e   : > { %608 = vsyncadd (%p435_p10), %s316_s10, 4294967168  ;;  %s21_s19 = sadd.s32 1, %s631_s19   ;;  %s881_s14 = smov %s615_s15 }
  0x8f   : > { %p18_p8 = scmp.ge.s32.totalorder %s21_s19, 4   ;;  %s882_s15 = smov %s619_s16 }
  0x90   : > { %s883_s16 = smov %s773_s5  ;;  %s884_s17 = smov %s627_s18 }
  0x91   : > { %s885_s18 = smov %s887_s6  ;;  %20 = sbr.rel (!%p18_p8) target bundleno = 9 (0x9), region = 82 }
  0x96   :  { %321 = vsyncpa [#allocation4], 1 }
  0x97   :  { %323 = vsyncpa [#allocation4 + $0x1], 1 }
  0x98   :  { %324 = vsyncpa [#allocation5], 1 }
  0x99   :  { %326 = vsyncpa [#allocation5 + $0x1], 1 }
  0x9a   :  { %327 = vsyncpa [#allocation6], 1 }
  0x9b   :  { %329 = vsyncpa [#allocation6 + $0x1], 1 }

</bundles_post_ra>
